<compile_context>
chip_gen: v6e
topology: v6e:2x2x1
jax: 0.10.0
libtpu: 0.0.40
codegen_flags: <defaults>
</compile_context>

<pallas_src>
import functools

import jax
import jax.numpy as jnp
from jax import lax
from jax.experimental import pallas as pl
from jax.experimental.pallas import tpu as pltpu
import numpy as np


def _round_up(x, m):
    return (x + m - 1) // m * m


def _conv_bn_relu_kernel(x_ref, w_ref, scale_ref, shift_ref, o_ref,
                         xpad_ref, patch_ref,
                         *, ks, pad_h, pad_w, ring, H, W, H_pad, W_pad,
                         H_out, W_out, nf, n_pad, batch_block):
    """One batch block: pad -> im2col -> ONE matmul -> BN affine -> ReLU.

    x_ref:     (B_blk, C_in, H, W)        input images (compute dtype)
    w_ref:     (C_out, K=ks*ks*C_in)      conv weights, (kw, kh, c) ordering
    scale_ref: (C_out, 1)                 folded BN scale              (f32)
    shift_ref: (C_out, 1)                 folded conv-bias + BN shift  (f32)
    o_ref:     (C_out, B_blk * n_pad)     lane-dense output slab
    xpad_ref:  (C_in, H_pad, W_pad)       padded-image staging buffer
    patch_ref: (K, B_blk * n_pad)         im2col matrix for the whole block
    """
    C_in = x_ref.shape[1]
    zdt = xpad_ref.dtype
    kc = ks * C_in

    # Zero only the padding halo; the interior is fully rewritten per image.
    # Done every grid step (cheap) rather than guarded on program_id == 0,
    # which would be unsafe under megacore sharding of the "parallel" axis.
    if pad_h:
        xpad_ref[:, 0:pad_h, :] = jnp.zeros((C_in, pad_h, W_pad), zdt)
        xpad_ref[:, pad_h + H:H_pad, :] = jnp.zeros((C_in, pad_h, W_pad), zdt)
    if pad_w and not ring:
        xpad_ref[:, pad_h:pad_h + H, 0:pad_w] = jnp.zeros((C_in, H, pad_w), zdt)
        xpad_ref[:, pad_h:pad_h + H, pad_w + W:W_pad] = jnp.zeros(
            (C_in, H, pad_w), zdt)

    # Static loop: batch_block is small (<= 8) and the per-image body is now
    # only ~(ks*H_out + ks + 3) small statements.
    for b in range(batch_block):
        img = x_ref[b]                                    # (C_in, H, W)
        xpad_ref[:, pad_h:pad_h + H, pad_w:pad_w + W] = img
        if ring:
            # circular pad of width 1 on W: F.pad(x, (1, 1, 0, 0), 'circular')
            xpad_ref[:, pad_h:pad_h + H, 0:1] = img[:, :, W - 1:W]
            xpad_ref[:, pad_h:pad_h + H, pad_w + W:pad_w + W + 1] = img[:, :, 0:1]

        col0 = b * n_pad                                  # static, 128-aligned
        # Flatten the stride-2 conv rows into the kw=0 row block of the patch:
        # rows ordered (kh, c), columns (ho, w_pad) with period W_pad.
        for kh in range(ks):
            r0 = kh * C_in
            for ho in range(H_out):
                patch_ref[r0:r0 + C_in,
                          col0 + ho * W_pad:col0 + (ho + 1) * W_pad] = (
                    xpad_ref[:, 2 * ho + kh, :])
        # Remaining kw taps are pure lane shifts of the kw=0 block: one wide
        # copy per kw covering every (kh, c) row at once.  Columns past the
        # shifted width only hit invalid (trimmed) output positions.
        for kw in range(1, ks):
            patch_ref[kw * kc:(kw + 1) * kc, col0:col0 + nf - kw] = (
                patch_ref[0:kc, col0 + kw:col0 + nf])

    # One lane-dense MXU contraction and one f32 epilogue for the whole block.
    acc = jnp.dot(w_ref[...], patch_ref[...],
                  preferred_element_type=jnp.float32)     # (C_out, B_blk*n_pad)
    y = acc * scale_ref[...] + shift_ref[...]             # folded BN (inference)
    o_ref[...] = jnp.maximum(y, 0.0).astype(o_ref.dtype)


def _pick_batch_block(N, per_image_bytes, fixed_bytes, budget_bytes):
    """Largest batch block that divides N, fits the VMEM budget, and (when
    possible) leaves an even grid of length >= 2 (v7x has 2 TensorCores)."""
    fits = [c for c in (8, 4, 2, 1)
            if N % c == 0 and fixed_bytes + c * per_image_bytes <= budget_bytes]
    if not fits:
        fits = [1]
    for c in fits:                       # grid >= 2 and even
        if (N // c) >= 2 and (N // c) % 2 == 0:
            return c
    for c in fits:                       # grid >= 2
        if (N // c) >= 2:
            return c
    return fits[0]


def conv_compress_h(x, w, conv_bias, bn_gamma, bn_beta, bn_mean, bn_var,
                    *, ring_conv, eps=1e-5, batch_block=None,
                    compute_dtype=jnp.bfloat16):
    """Pallas implementation of ConvCompressH.forward (NCHW, eval-mode BN)."""
    N, C_in, H, W = x.shape
    C_out, _, ks, _ = w.shape
    assert ks % 2 == 1

    pad_h = ks // 2
    # ring_conv: F.pad(x, (1,1,0,0), 'circular') + conv padding (ks//2, 0)
    # otherwise: conv padding ks//2 on both H and W (zeros).
    pad_w = 1 if ring_conv else ks // 2
    H_pad, W_pad = H + 2 * pad_h, W + 2 * pad_w
    H_out = (H_pad - ks) // 2 + 1
    W_out = W_pad - ks + 1
    nf = H_out * W_pad                      # per-image patch columns (w period W_pad)
    n_pad = _round_up(nf, 128)              # lane-aligned per-image column block
    K = C_in * ks * ks
    out_dtype = x.dtype
    cbytes = jnp.dtype(compute_dtype).itemsize
    obytes = jnp.dtype(out_dtype).itemsize

    if batch_block is None:
        per_img = (2 * C_in * H * _round_up(W, 128) * cbytes       # x (2-buffered)
                   + 2 * C_out * n_pad * obytes                    # out (2-buffered)
                   + K * n_pad * cbytes)                           # patch columns
        fixed = (C_in * _round_up(H_pad, 8) * _round_up(W_pad, 128) * cbytes
                 + _round_up(C_out, 8) * _round_up(K, 128) * cbytes)
        batch_block = _pick_batch_block(N, per_img, fixed, 12 * 1024 * 1024)
    assert N % batch_block == 0
    grid_len = N // batch_block

    # Weights in (kw, kh, c) contraction order (matches the in-kernel patch
    # row layout), compute dtype (bf16 by default -> native MXU passes).
    w_mat = jnp.transpose(w, (0, 3, 2, 1)).reshape(C_out, K).astype(compute_dtype)
    xc = x.astype(compute_dtype)

    # Fold conv bias + BatchNorm (eval mode) into per-channel scale/shift (f32).
    scale = (bn_gamma.astype(jnp.float32)
             / jnp.sqrt(bn_var.astype(jnp.float32) + eps))
    shift = ((conv_bias - bn_mean).astype(jnp.float32) * scale
             + bn_beta.astype(jnp.float32))
    scale2 = scale.reshape(C_out, 1)
    shift2 = shift.reshape(C_out, 1)

    kernel = functools.partial(
        _conv_bn_relu_kernel,
        ks=ks, pad_h=pad_h, pad_w=pad_w, ring=bool(ring_conv),
        H=H, W=W, H_pad=H_pad, W_pad=W_pad, H_out=H_out, W_out=W_out,
        nf=nf, n_pad=n_pad, batch_block=batch_block)

    out = pl.pallas_call(
        kernel,
        out_shape=jax.ShapeDtypeStruct((grid_len, C_out, batch_block * n_pad),
                                       out_dtype),
        grid_spec=pltpu.PrefetchScalarGridSpec(
            num_scalar_prefetch=0,
            grid=(grid_len,),
            in_specs=[
                pl.BlockSpec((batch_block, C_in, H, W), lambda n: (n, 0, 0, 0)),
                pl.BlockSpec((C_out, K), lambda n: (0, 0)),
                pl.BlockSpec((C_out, 1), lambda n: (0, 0)),
                pl.BlockSpec((C_out, 1), lambda n: (0, 0)),
            ],
            out_specs=pl.BlockSpec((None, C_out, batch_block * n_pad),
                                   lambda n: (n, 0, 0)),
            scratch_shapes=[
                pltpu.VMEM((C_in, H_pad, W_pad), compute_dtype),   # padded image
                pltpu.VMEM((K, batch_block * n_pad), compute_dtype),  # im2col
            ],
        ),
        compiler_params=pltpu.CompilerParams(
            dimension_semantics=("parallel",)),
    )(xc, w_mat, scale2, shift2)

    # Trim lane padding / invalid w columns and reorder back to NCHW
    # (cheap XLA ops on the small output).
    out = out.reshape(grid_len, C_out, batch_block, n_pad)[..., :nf]
    out = out.reshape(grid_len, C_out, batch_block, H_out, W_pad)[..., :W_out]
    out = jnp.transpose(out, (0, 2, 1, 3, 4))
    return out.reshape(N, C_out, H_out, W_out)


def _reference(x, w, conv_bias, bn_gamma, bn_beta, bn_mean, bn_var,
               *, ring_conv, eps=1e-5):
    """Pure-JAX reference matching the PyTorch forward (eval-mode BN)."""
    pad = w.shape[2] // 2
    if ring_conv:
        x_in = jnp.pad(x, ((0, 0), (0, 0), (0, 0), (1, 1)), mode="wrap")
        padding = ((pad, pad), (0, 0))
    else:
        x_in = x
        padding = ((pad, pad), (pad, pad))
    y = lax.conv_general_dilated(
        x_in, w, window_strides=(2, 1), padding=padding,
        dimension_numbers=("NCHW", "OIHW", "NCHW"))
    y = y + conv_bias.reshape(1, -1, 1, 1)
    y = (y - bn_mean.reshape(1, -1, 1, 1)) / jnp.sqrt(
        bn_var.reshape(1, -1, 1, 1) + eps)
    y = y * bn_gamma.reshape(1, -1, 1, 1) + bn_beta.reshape(1, -1, 1, 1)
    return jnp.maximum(y, 0.0)


if __name__ == "__main__":
    key = jax.random.PRNGKey(0)
    N, C_in, C_out, H, W, ks = 2, 4, 8, 16, 16, 3

    k = jax.random.split(key, 8)
    x = jax.random.normal(k[0], (N, C_in, H, W), jnp.float32)
    w = jax.random.normal(k[1], (C_out, C_in, ks, ks), jnp.float32) * 0.1
    conv_bias = jax.random.normal(k[2], (C_out,), jnp.float32) * 0.1
    bn_gamma = 0.5 + jax.random.uniform(k[3], (C_out,), jnp.float32)
    bn_beta = jax.random.normal(k[4], (C_out,), jnp.float32) * 0.1
    bn_mean = jax.random.normal(k[5], (C_out,), jnp.float32) * 0.1
    bn_var = 0.5 + jax.random.uniform(k[6], (C_out,), jnp.float32)

    ok = True
    for ring_conv in (False, True):
        ref = _reference(x, w, conv_bias, bn_gamma, bn_beta, bn_mean, bn_var,
                         ring_conv=ring_conv)
        # Exact-path check (f32 compute) and default bf16 fast path.
        for compute_dtype, atol, rtol in ((jnp.float32, 1e-4, 1e-4),
                                          (jnp.bfloat16, 5e-2, 5e-2)):
            out = conv_compress_h(x, w, conv_bias, bn_gamma, bn_beta, bn_mean,
                                  bn_var, ring_conv=ring_conv,
                                  compute_dtype=compute_dtype)
            out = jax.block_until_ready(out)
            assert out.shape == (N, C_out, (H + 1) // 2, W), out.shape
            if not np.allclose(np.asarray(out), np.asarray(ref),
                               atol=atol, rtol=rtol):
                ok = False

    print("KERNEL_OK" if ok else "KERNEL_MISMATCH")
</pallas_src>

<mosaic_0001>
module attributes {stable_mosaic.version = 11 : i64} {
  func.func @_conv_bn_relu_kernel(%arg0: i32, %arg1: memref<1x4x16x16xf32, #tpu.memory_space<vmem>>, %arg2: memref<8x36xf32, #tpu.memory_space<vmem>>, %arg3: memref<8x1xf32, #tpu.memory_space<vmem>>, %arg4: memref<8x1xf32, #tpu.memory_space<vmem>>, %arg5: memref<1x8x256xf32, #tpu.memory_space<vmem>>, %arg6: memref<4x18x18xf32, #tpu.memory_space<vmem>>, %arg7: memref<36x256xf32, #tpu.memory_space<vmem>>) attributes {dimension_semantics = [#tpu.dimension_semantics<parallel>], iteration_bounds = array<i64: 2>, scalar_prefetch = 0 : i64, scratch_operands = 2 : i64, tpu.core_type = #tpu.core_type<tc>, window_params = [{transform_indices = @transform_0, window_bounds = array<i64: 1, 4, 16, 16>}, {pipeline_mode = #tpu.pipeline_mode<synchronous>, transform_indices = @transform_1, window_bounds = array<i64: 8, 36>}, {pipeline_mode = #tpu.pipeline_mode<synchronous>, transform_indices = @transform_2, window_bounds = array<i64: 8, 1>}, {pipeline_mode = #tpu.pipeline_mode<synchronous>, transform_indices = @transform_3, window_bounds = array<i64: 8, 1>}, {transform_indices = @transform_4, window_bounds = array<i64: 1, 8, 256>}]} {
    %cst = arith.constant 0.000000e+00 : f32
    %0 = vector.broadcast %cst : f32 to vector<4x1x18xf32>
    %c0 = arith.constant 0 : index
    %c0_0 = arith.constant 0 : index
    %c0_1 = arith.constant 0 : index
    %1 = vector.load %arg6[%c0, %c0_0, %c0_1] : memref<4x18x18xf32, #tpu.memory_space<vmem>>, vector<4x1x18xf32>
    tpu.vector_store %arg6[%c0, %c0_0, %c0_1], %0 {strides = array<i32>} : memref<4x18x18xf32, #tpu.memory_space<vmem>>, vector<4x1x18xf32>,
    %cst_2 = arith.constant 0.000000e+00 : f32
    %2 = vector.broadcast %cst_2 : f32 to vector<4x1x18xf32>
    %c0_3 = arith.constant 0 : index
    %c17 = arith.constant 17 : index
    %c0_4 = arith.constant 0 : index
    %3 = vector.load %arg6[%c0_3, %c17, %c0_4] : memref<4x18x18xf32, #tpu.memory_space<vmem>>, vector<4x1x18xf32>
    tpu.vector_store %arg6[%c0_3, %c17, %c0_4], %2 {strides = array<i32>} : memref<4x18x18xf32, #tpu.memory_space<vmem>>, vector<4x1x18xf32>,
    %cst_5 = arith.constant 0.000000e+00 : f32
    %4 = vector.broadcast %cst_5 : f32 to vector<4x16x1xf32>
    %c0_6 = arith.constant 0 : index
    %c1 = arith.constant 1 : index
    %c0_7 = arith.constant 0 : index
    %5 = vector.load %arg6[%c0_6, %c1, %c0_7] : memref<4x18x18xf32, #tpu.memory_space<vmem>>, vector<4x16x1xf32>
    tpu.vector_store %arg6[%c0_6, %c1, %c0_7], %4 {strides = array<i32>} : memref<4x18x18xf32, #tpu.memory_space<vmem>>, vector<4x16x1xf32>,
    %cst_8 = arith.constant 0.000000e+00 : f32
    %6 = vector.broadcast %cst_8 : f32 to vector<4x16x1xf32>
    %c0_9 = arith.constant 0 : index
    %c1_10 = arith.constant 1 : index
    %c17_11 = arith.constant 17 : index
    %7 = vector.load %arg6[%c0_9, %c1_10, %c17_11] : memref<4x18x18xf32, #tpu.memory_space<vmem>>, vector<4x16x1xf32>
    tpu.vector_store %arg6[%c0_9, %c1_10, %c17_11], %6 {strides = array<i32>} : memref<4x18x18xf32, #tpu.memory_space<vmem>>, vector<4x16x1xf32>,
    %c0_12 = arith.constant 0 : index
    %c0_13 = arith.constant 0 : index
    %c0_14 = arith.constant 0 : index
    %c0_15 = arith.constant 0 : index
    %8 = vector.load %arg1[%c0_12, %c0_13, %c0_14, %c0_15] : memref<1x4x16x16xf32, #tpu.memory_space<vmem>>, vector<1x4x16x16xf32>
    %9 = vector.shape_cast %8 : vector<1x4x16x16xf32> to vector<4x16x16xf32>
    %c0_16 = arith.constant 0 : index
    %c1_17 = arith.constant 1 : index
    %c1_18 = arith.constant 1 : index
    %10 = vector.load %arg6[%c0_16, %c1_17, %c1_18] : memref<4x18x18xf32, #tpu.memory_space<vmem>>, vector<4x16x16xf32>
    tpu.vector_store %arg6[%c0_16, %c1_17, %c1_18], %9 {strides = array<i32>} : memref<4x18x18xf32, #tpu.memory_space<vmem>>, vector<4x16x16xf32>,
    %c0_19 = arith.constant 0 : index
    %c0_20 = arith.constant 0 : index
    %c0_21 = arith.constant 0 : index
    %11 = vector.load %arg6[%c0_19, %c0_20, %c0_21] : memref<4x18x18xf32, #tpu.memory_space<vmem>>, vector<4x1x18xf32>
    %12 = vector.shape_cast %11 : vector<4x1x18xf32> to vector<4x18xf32>
    %c0_22 = arith.constant 0 : index
    %c0_23 = arith.constant 0 : index
    %13 = vector.load %arg7[%c0_22, %c0_23] : memref<36x256xf32, #tpu.memory_space<vmem>>, vector<4x18xf32>
    tpu.vector_store %arg7[%c0_22, %c0_23], %12 {strides = array<i32>} : memref<36x256xf32, #tpu.memory_space<vmem>>, vector<4x18xf32>,
    %c0_24 = arith.constant 0 : index
    %c2 = arith.constant 2 : index
    %c0_25 = arith.constant 0 : index
    %14 = vector.load %arg6[%c0_24, %c2, %c0_25] : memref<4x18x18xf32, #tpu.memory_space<vmem>>, vector<4x1x18xf32>
    %15 = vector.shape_cast %14 : vector<4x1x18xf32> to vector<4x18xf32>
    %c0_26 = arith.constant 0 : index
    %c18 = arith.constant 18 : index
    %16 = vector.load %arg7[%c0_26, %c18] : memref<36x256xf32, #tpu.memory_space<vmem>>, vector<4x18xf32>
    tpu.vector_store %arg7[%c0_26, %c18], %15 {strides = array<i32>} : memref<36x256xf32, #tpu.memory_space<vmem>>, vector<4x18xf32>,
    %c0_27 = arith.constant 0 : index
    %c4 = arith.constant 4 : index
    %c0_28 = arith.constant 0 : index
    %17 = vector.load %arg6[%c0_27, %c4, %c0_28] : memref<4x18x18xf32, #tpu.memory_space<vmem>>, vector<4x1x18xf32>
    %18 = vector.shape_cast %17 : vector<4x1x18xf32> to vector<4x18xf32>
    %c0_29 = arith.constant 0 : index
    %c36 = arith.constant 36 : index
    %19 = vector.load %arg7[%c0_29, %c36] : memref<36x256xf32, #tpu.memory_space<vmem>>, vector<4x18xf32>
    tpu.vector_store %arg7[%c0_29, %c36], %18 {strides = array<i32>} : memref<36x256xf32, #tpu.memory_space<vmem>>, vector<4x18xf32>,
    %c0_30 = arith.constant 0 : index
    %c6 = arith.constant 6 : index
    %c0_31 = arith.constant 0 : index
    %20 = vector.load %arg6[%c0_30, %c6, %c0_31] : memref<4x18x18xf32, #tpu.memory_space<vmem>>, vector<4x1x18xf32>
    %21 = vector.shape_cast %20 : vector<4x1x18xf32> to vector<4x18xf32>
    %c0_32 = arith.constant 0 : index
    %c54 = arith.constant 54 : index
    %22 = vector.load %arg7[%c0_32, %c54] : memref<36x256xf32, #tpu.memory_space<vmem>>, vector<4x18xf32>
    tpu.vector_store %arg7[%c0_32, %c54], %21 {strides = array<i32>} : memref<36x256xf32, #tpu.memory_space<vmem>>, vector<4x18xf32>,
    %c0_33 = arith.constant 0 : index
    %c8 = arith.constant 8 : index
    %c0_34 = arith.constant 0 : index
    %23 = vector.load %arg6[%c0_33, %c8, %c0_34] : memref<4x18x18xf32, #tpu.memory_space<vmem>>, vector<4x1x18xf32>
    %24 = vector.shape_cast %23 : vector<4x1x18xf32> to vector<4x18xf32>
    %c0_35 = arith.constant 0 : index
    %c72 = arith.constant 72 : index
    %25 = vector.load %arg7[%c0_35, %c72] : memref<36x256xf32, #tpu.memory_space<vmem>>, vector<4x18xf32>
    tpu.vector_store %arg7[%c0_35, %c72], %24 {strides = array<i32>} : memref<36x256xf32, #tpu.memory_space<vmem>>, vector<4x18xf32>,
    %c0_36 = arith.constant 0 : index
    %c10 = arith.constant 10 : index
    %c0_37 = arith.constant 0 : index
    %26 = vector.load %arg6[%c0_36, %c10, %c0_37] : memref<4x18x18xf32, #tpu.memory_space<vmem>>, vector<4x1x18xf32>
    %27 = vector.shape_cast %26 : vector<4x1x18xf32> to vector<4x18xf32>
    %c0_38 = arith.constant 0 : index
    %c90 = arith.constant 90 : index
    %28 = vector.load %arg7[%c0_38, %c90] : memref<36x256xf32, #tpu.memory_space<vmem>>, vector<4x18xf32>
    tpu.vector_store %arg7[%c0_38, %c90], %27 {strides = array<i32>} : memref<36x256xf32, #tpu.memory_space<vmem>>, vector<4x18xf32>,
    %c0_39 = arith.constant 0 : index
    %c12 = arith.constant 12 : index
    %c0_40 = arith.constant 0 : index
    %29 = vector.load %arg6[%c0_39, %c12, %c0_40] : memref<4x18x18xf32, #tpu.memory_space<vmem>>, vector<4x1x18xf32>
    %30 = vector.shape_cast %29 : vector<4x1x18xf32> to vector<4x18xf32>
    %c0_41 = arith.constant 0 : index
    %c108 = arith.constant 108 : index
    %31 = vector.load %arg7[%c0_41, %c108] : memref<36x256xf32, #tpu.memory_space<vmem>>, vector<4x18xf32>
    tpu.vector_store %arg7[%c0_41, %c108], %30 {strides = array<i32>} : memref<36x256xf32, #tpu.memory_space<vmem>>, vector<4x18xf32>,
    %c0_42 = arith.constant 0 : index
    %c14 = arith.constant 14 : index
    %c0_43 = arith.constant 0 : index
    %32 = vector.load %arg6[%c0_42, %c14, %c0_43] : memref<4x18x18xf32, #tpu.memory_space<vmem>>, vector<4x1x18xf32>
    %33 = vector.shape_cast %32 : vector<4x1x18xf32> to vector<4x18xf32>
    %c0_44 = arith.constant 0 : index
    %c126 = arith.constant 126 : index
    %34 = vector.load %arg7[%c0_44, %c126] : memref<36x256xf32, #tpu.memory_space<vmem>>, vector<4x18xf32>
    tpu.vector_store %arg7[%c0_44, %c126], %33 {strides = array<i32>} : memref<36x256xf32, #tpu.memory_space<vmem>>, vector<4x18xf32>,
    %c0_45 = arith.constant 0 : index
    %c1_46 = arith.constant 1 : index
    %c0_47 = arith.constant 0 : index
    %35 = vector.load %arg6[%c0_45, %c1_46, %c0_47] : memref<4x18x18xf32, #tpu.memory_space<vmem>>, vector<4x1x18xf32>
    %36 = vector.shape_cast %35 : vector<4x1x18xf32> to vector<4x18xf32>
    %c4_48 = arith.constant 4 : index
    %c0_49 = arith.constant 0 : index
    %37 = vector.load %arg7[%c4_48, %c0_49] : memref<36x256xf32, #tpu.memory_space<vmem>>, vector<4x18xf32>
    tpu.vector_store %arg7[%c4_48, %c0_49], %36 {strides = array<i32>} : memref<36x256xf32, #tpu.memory_space<vmem>>, vector<4x18xf32>,
    %c0_50 = arith.constant 0 : index
    %c3 = arith.constant 3 : index
    %c0_51 = arith.constant 0 : index
    %38 = vector.load %arg6[%c0_50, %c3, %c0_51] : memref<4x18x18xf32, #tpu.memory_space<vmem>>, vector<4x1x18xf32>
    %39 = vector.shape_cast %38 : vector<4x1x18xf32> to vector<4x18xf32>
    %c4_52 = arith.constant 4 : index
    %c18_53 = arith.constant 18 : index
    %40 = vector.load %arg7[%c4_52, %c18_53] : memref<36x256xf32, #tpu.memory_space<vmem>>, vector<4x18xf32>
    tpu.vector_store %arg7[%c4_52, %c18_53], %39 {strides = array<i32>} : memref<36x256xf32, #tpu.memory_space<vmem>>, vector<4x18xf32>,
    %c0_54 = arith.constant 0 : index
    %c5 = arith.constant 5 : index
    %c0_55 = arith.constant 0 : index
    %41 = vector.load %arg6[%c0_54, %c5, %c0_55] : memref<4x18x18xf32, #tpu.memory_space<vmem>>, vector<4x1x18xf32>
    %42 = vector.shape_cast %41 : vector<4x1x18xf32> to vector<4x18xf32>
    %c4_56 = arith.constant 4 : index
    %c36_57 = arith.constant 36 : index
    %43 = vector.load %arg7[%c4_56, %c36_57] : memref<36x256xf32, #tpu.memory_space<vmem>>, vector<4x18xf32>
    tpu.vector_store %arg7[%c4_56, %c36_57], %42 {strides = array<i32>} : memref<36x256xf32, #tpu.memory_space<vmem>>, vector<4x18xf32>,
    %c0_58 = arith.constant 0 : index
    %c7 = arith.constant 7 : index
    %c0_59 = arith.constant 0 : index
    %44 = vector.load %arg6[%c0_58, %c7, %c0_59] : memref<4x18x18xf32, #tpu.memory_space<vmem>>, vector<4x1x18xf32>
    %45 = vector.shape_cast %44 : vector<4x1x18xf32> to vector<4x18xf32>
    %c4_60 = arith.constant 4 : index
    %c54_61 = arith.constant 54 : index
    %46 = vector.load %arg7[%c4_60, %c54_61] : memref<36x256xf32, #tpu.memory_space<vmem>>, vector<4x18xf32>
    tpu.vector_store %arg7[%c4_60, %c54_61], %45 {strides = array<i32>} : memref<36x256xf32, #tpu.memory_space<vmem>>, vector<4x18xf32>,
    %c0_62 = arith.constant 0 : index
    %c9 = arith.constant 9 : index
    %c0_63 = arith.constant 0 : index
    %47 = vector.load %arg6[%c0_62, %c9, %c0_63] : memref<4x18x18xf32, #tpu.memory_space<vmem>>, vector<4x1x18xf32>
    %48 = vector.shape_cast %47 : vector<4x1x18xf32> to vector<4x18xf32>
    %c4_64 = arith.constant 4 : index
    %c72_65 = arith.constant 72 : index
    %49 = vector.load %arg7[%c4_64, %c72_65] : memref<36x256xf32, #tpu.memory_space<vmem>>, vector<4x18xf32>
    tpu.vector_store %arg7[%c4_64, %c72_65], %48 {strides = array<i32>} : memref<36x256xf32, #tpu.memory_space<vmem>>, vector<4x18xf32>,
    %c0_66 = arith.constant 0 : index
    %c11 = arith.constant 11 : index
    %c0_67 = arith.constant 0 : index
    %50 = vector.load %arg6[%c0_66, %c11, %c0_67] : memref<4x18x18xf32, #tpu.memory_space<vmem>>, vector<4x1x18xf32>
    %51 = vector.shape_cast %50 : vector<4x1x18xf32> to vector<4x18xf32>
    %c4_68 = arith.constant 4 : index
    %c90_69 = arith.constant 90 : index
    %52 = vector.load %arg7[%c4_68, %c90_69] : memref<36x256xf32, #tpu.memory_space<vmem>>, vector<4x18xf32>
    tpu.vector_store %arg7[%c4_68, %c90_69], %51 {strides = array<i32>} : memref<36x256xf32, #tpu.memory_space<vmem>>, vector<4x18xf32>,
    %c0_70 = arith.constant 0 : index
    %c13 = arith.constant 13 : index
    %c0_71 = arith.constant 0 : index
    %53 = vector.load %arg6[%c0_70, %c13, %c0_71] : memref<4x18x18xf32, #tpu.memory_space<vmem>>, vector<4x1x18xf32>
    %54 = vector.shape_cast %53 : vector<4x1x18xf32> to vector<4x18xf32>
    %c4_72 = arith.constant 4 : index
    %c108_73 = arith.constant 108 : index
    %55 = vector.load %arg7[%c4_72, %c108_73] : memref<36x256xf32, #tpu.memory_space<vmem>>, vector<4x18xf32>
    tpu.vector_store %arg7[%c4_72, %c108_73], %54 {strides = array<i32>} : memref<36x256xf32, #tpu.memory_space<vmem>>, vector<4x18xf32>,
    %c0_74 = arith.constant 0 : index
    %c15 = arith.constant 15 : index
    %c0_75 = arith.constant 0 : index
    %56 = vector.load %arg6[%c0_74, %c15, %c0_75] : memref<4x18x18xf32, #tpu.memory_space<vmem>>, vector<4x1x18xf32>
    %57 = vector.shape_cast %56 : vector<4x1x18xf32> to vector<4x18xf32>
    %c4_76 = arith.constant 4 : index
    %c126_77 = arith.constant 126 : index
    %58 = vector.load %arg7[%c4_76, %c126_77] : memref<36x256xf32, #tpu.memory_space<vmem>>, vector<4x18xf32>
    tpu.vector_store %arg7[%c4_76, %c126_77], %57 {strides = array<i32>} : memref<36x256xf32, #tpu.memory_space<vmem>>, vector<4x18xf32>,
    %c0_78 = arith.constant 0 : index
    %c2_79 = arith.constant 2 : index
    %c0_80 = arith.constant 0 : index
    %59 = vector.load %arg6[%c0_78, %c2_79, %c0_80] : memref<4x18x18xf32, #tpu.memory_space<vmem>>, vector<4x1x18xf32>
    %60 = vector.shape_cast %59 : vector<4x1x18xf32> to vector<4x18xf32>
    %c8_81 = arith.constant 8 : index
    %c0_82 = arith.constant 0 : index
    %61 = vector.load %arg7[%c8_81, %c0_82] : memref<36x256xf32, #tpu.memory_space<vmem>>, vector<4x18xf32>
    tpu.vector_store %arg7[%c8_81, %c0_82], %60 {strides = array<i32>} : memref<36x256xf32, #tpu.memory_space<vmem>>, vector<4x18xf32>,
    %c0_83 = arith.constant 0 : index
    %c4_84 = arith.constant 4 : index
    %c0_85 = arith.constant 0 : index
    %62 = vector.load %arg6[%c0_83, %c4_84, %c0_85] : memref<4x18x18xf32, #tpu.memory_space<vmem>>, vector<4x1x18xf32>
    %63 = vector.shape_cast %62 : vector<4x1x18xf32> to vector<4x18xf32>
    %c8_86 = arith.constant 8 : index
    %c18_87 = arith.constant 18 : index
    %64 = vector.load %arg7[%c8_86, %c18_87] : memref<36x256xf32, #tpu.memory_space<vmem>>, vector<4x18xf32>
    tpu.vector_store %arg7[%c8_86, %c18_87], %63 {strides = array<i32>} : memref<36x256xf32, #tpu.memory_space<vmem>>, vector<4x18xf32>,
    %c0_88 = arith.constant 0 : index
    %c6_89 = arith.constant 6 : index
    %c0_90 = arith.constant 0 : index
    %65 = vector.load %arg6[%c0_88, %c6_89, %c0_90] : memref<4x18x18xf32, #tpu.memory_space<vmem>>, vector<4x1x18xf32>
    %66 = vector.shape_cast %65 : vector<4x1x18xf32> to vector<4x18xf32>
    %c8_91 = arith.constant 8 : index
    %c36_92 = arith.constant 36 : index
    %67 = vector.load %arg7[%c8_91, %c36_92] : memref<36x256xf32, #tpu.memory_space<vmem>>, vector<4x18xf32>
    tpu.vector_store %arg7[%c8_91, %c36_92], %66 {strides = array<i32>} : memref<36x256xf32, #tpu.memory_space<vmem>>, vector<4x18xf32>,
    %c0_93 = arith.constant 0 : index
    %c8_94 = arith.constant 8 : index
    %c0_95 = arith.constant 0 : index
    %68 = vector.load %arg6[%c0_93, %c8_94, %c0_95] : memref<4x18x18xf32, #tpu.memory_space<vmem>>, vector<4x1x18xf32>
    %69 = vector.shape_cast %68 : vector<4x1x18xf32> to vector<4x18xf32>
    %c8_96 = arith.constant 8 : index
    %c54_97 = arith.constant 54 : index
    %70 = vector.load %arg7[%c8_96, %c54_97] : memref<36x256xf32, #tpu.memory_space<vmem>>, vector<4x18xf32>
    tpu.vector_store %arg7[%c8_96, %c54_97], %69 {strides = array<i32>} : memref<36x256xf32, #tpu.memory_space<vmem>>, vector<4x18xf32>,
    %c0_98 = arith.constant 0 : index
    %c10_99 = arith.constant 10 : index
    %c0_100 = arith.constant 0 : index
    %71 = vector.load %arg6[%c0_98, %c10_99, %c0_100] : memref<4x18x18xf32, #tpu.memory_space<vmem>>, vector<4x1x18xf32>
    %72 = vector.shape_cast %71 : vector<4x1x18xf32> to vector<4x18xf32>
    %c8_101 = arith.constant 8 : index
    %c72_102 = arith.constant 72 : index
    %73 = vector.load %arg7[%c8_101, %c72_102] : memref<36x256xf32, #tpu.memory_space<vmem>>, vector<4x18xf32>
    tpu.vector_store %arg7[%c8_101, %c72_102], %72 {strides = array<i32>} : memref<36x256xf32, #tpu.memory_space<vmem>>, vector<4x18xf32>,
    %c0_103 = arith.constant 0 : index
    %c12_104 = arith.constant 12 : index
    %c0_105 = arith.constant 0 : index
    %74 = vector.load %arg6[%c0_103, %c12_104, %c0_105] : memref<4x18x18xf32, #tpu.memory_space<vmem>>, vector<4x1x18xf32>
    %75 = vector.shape_cast %74 : vector<4x1x18xf32> to vector<4x18xf32>
    %c8_106 = arith.constant 8 : index
    %c90_107 = arith.constant 90 : index
    %76 = vector.load %arg7[%c8_106, %c90_107] : memref<36x256xf32, #tpu.memory_space<vmem>>, vector<4x18xf32>
    tpu.vector_store %arg7[%c8_106, %c90_107], %75 {strides = array<i32>} : memref<36x256xf32, #tpu.memory_space<vmem>>, vector<4x18xf32>,
    %c0_108 = arith.constant 0 : index
    %c14_109 = arith.constant 14 : index
    %c0_110 = arith.constant 0 : index
    %77 = vector.load %arg6[%c0_108, %c14_109, %c0_110] : memref<4x18x18xf32, #tpu.memory_space<vmem>>, vector<4x1x18xf32>
    %78 = vector.shape_cast %77 : vector<4x1x18xf32> to vector<4x18xf32>
    %c8_111 = arith.constant 8 : index
    %c108_112 = arith.constant 108 : index
    %79 = vector.load %arg7[%c8_111, %c108_112] : memref<36x256xf32, #tpu.memory_space<vmem>>, vector<4x18xf32>
    tpu.vector_store %arg7[%c8_111, %c108_112], %78 {strides = array<i32>} : memref<36x256xf32, #tpu.memory_space<vmem>>, vector<4x18xf32>,
    %c0_113 = arith.constant 0 : index
    %c16 = arith.constant 16 : index
    %c0_114 = arith.constant 0 : index
    %80 = vector.load %arg6[%c0_113, %c16, %c0_114] : memref<4x18x18xf32, #tpu.memory_space<vmem>>, vector<4x1x18xf32>
    %81 = vector.shape_cast %80 : vector<4x1x18xf32> to vector<4x18xf32>
    %c8_115 = arith.constant 8 : index
    %c126_116 = arith.constant 126 : index
    %82 = vector.load %arg7[%c8_115, %c126_116] : memref<36x256xf32, #tpu.memory_space<vmem>>, vector<4x18xf32>
    tpu.vector_store %arg7[%c8_115, %c126_116], %81 {strides = array<i32>} : memref<36x256xf32, #tpu.memory_space<vmem>>, vector<4x18xf32>,
    %c0_117 = arith.constant 0 : index
    %c1_118 = arith.constant 1 : index
    %83 = vector.load %arg7[%c0_117, %c1_118] : memref<36x256xf32, #tpu.memory_space<vmem>>, vector<12x143xf32>
    %c12_119 = arith.constant 12 : index
    %c0_120 = arith.constant 0 : index
    %84 = vector.load %arg7[%c12_119, %c0_120] : memref<36x256xf32, #tpu.memory_space<vmem>>, vector<12x143xf32>
    tpu.vector_store %arg7[%c12_119, %c0_120], %83 {strides = array<i32>} : memref<36x256xf32, #tpu.memory_space<vmem>>, vector<12x143xf32>,
    %c0_121 = arith.constant 0 : index
    %c2_122 = arith.constant 2 : index
    %85 = vector.load %arg7[%c0_121, %c2_122] : memref<36x256xf32, #tpu.memory_space<vmem>>, vector<12x142xf32>
    %c24 = arith.constant 24 : index
    %c0_123 = arith.constant 0 : index
    %86 = vector.load %arg7[%c24, %c0_123] : memref<36x256xf32, #tpu.memory_space<vmem>>, vector<12x142xf32>
    tpu.vector_store %arg7[%c24, %c0_123], %85 {strides = array<i32>} : memref<36x256xf32, #tpu.memory_space<vmem>>, vector<12x142xf32>,
    %c0_124 = arith.constant 0 : index
    %c0_125 = arith.constant 0 : index
    %87 = vector.load %arg2[%c0_124, %c0_125] : memref<8x36xf32, #tpu.memory_space<vmem>>, vector<8x36xf32>
    %c0_126 = arith.constant 0 : index
    %c0_127 = arith.constant 0 : index
    %88 = vector.load %arg7[%c0_126, %c0_127] : memref<36x256xf32, #tpu.memory_space<vmem>>, vector<36x256xf32>
    %cst_128 = arith.constant dense<0.000000e+00> : vector<8x256xf32>
    %89 = tpu.matmul %87, %88, %cst_128 {dimension_numbers = #tpu.dot_dimension_numbers<[1], [0], [0], [1], [0, 0, 1, 1], [], []>} : vector<8x36xf32>, vector<36x256xf32>, vector<8x256xf32> -> vector<8x256xf32>
    %c0_129 = arith.constant 0 : index
    %c0_130 = arith.constant 0 : index
    %90 = vector.load %arg3[%c0_129, %c0_130] : memref<8x1xf32, #tpu.memory_space<vmem>>, vector<8x1xf32>
    %91 = vector.broadcast %90 : vector<8x1xf32> to vector<8x256xf32>
    %92 = arith.mulf %89, %91 : vector<8x256xf32>
    %c0_131 = arith.constant 0 : index
    %c0_132 = arith.constant 0 : index
    %93 = vector.load %arg4[%c0_131, %c0_132] : memref<8x1xf32, #tpu.memory_space<vmem>>, vector<8x1xf32>
    %94 = vector.broadcast %93 : vector<8x1xf32> to vector<8x256xf32>
    %95 = arith.addf %92, %94 : vector<8x256xf32>
    %cst_133 = arith.constant 0.000000e+00 : f32
    %96 = vector.broadcast %cst_133 : f32 to vector<8x256xf32>
    %97 = arith.maximumf %95, %96 : vector<8x256xf32>
    %c0_134 = arith.constant 0 : index
    %c0_135 = arith.constant 0 : index
    %c0_136 = arith.constant 0 : index
    %98 = vector.load %arg5[%c0_134, %c0_135, %c0_136] : memref<1x8x256xf32, #tpu.memory_space<vmem>>, vector<1x8x256xf32>
    %99 = vector.shape_cast %98 : vector<1x8x256xf32> to vector<8x256xf32>
    %100 = vector.shape_cast %97 : vector<8x256xf32> to vector<1x8x256xf32>
    tpu.vector_store %arg5[%c0_134, %c0_135, %c0_136], %100 {strides = array<i32>} : memref<1x8x256xf32, #tpu.memory_space<vmem>>, vector<1x8x256xf32>,
    return
  }
  func.func @transform_0(%arg0: i32) -> (i32, i32, i32, i32) {
    %c0_i32 = arith.constant 0 : i32
    %c0_i32_0 = arith.constant 0 : i32
    %c0_i32_1 = arith.constant 0 : i32
    %c0_i32_2 = arith.constant 0 : i32
    return %arg0, %c0_i32, %c0_i32_0, %c0_i32_1 : i32, i32, i32, i32
  }
  func.func @transform_1(%arg0: i32) -> (i32, i32) {
    %c0_i32 = arith.constant 0 : i32
    %c0_i32_0 = arith.constant 0 : i32
    %c0_i32_1 = arith.constant 0 : i32
    return %c0_i32, %c0_i32_0 : i32, i32
  }
  func.func @transform_2(%arg0: i32) -> (i32, i32) {
    %c0_i32 = arith.constant 0 : i32
    %c0_i32_0 = arith.constant 0 : i32
    %c0_i32_1 = arith.constant 0 : i32
    return %c0_i32, %c0_i32_0 : i32, i32
  }
  func.func @transform_3(%arg0: i32) -> (i32, i32) {
    %c0_i32 = arith.constant 0 : i32
    %c0_i32_0 = arith.constant 0 : i32
    %c0_i32_1 = arith.constant 0 : i32
    return %c0_i32, %c0_i32_0 : i32, i32
  }
  func.func @transform_4(%arg0: i32) -> (i32, i32, i32) {
    %c0_i32 = arith.constant 0 : i32
    %c0_i32_0 = arith.constant 0 : i32
    %c0_i32_1 = arith.constant 0 : i32
    return %arg0, %c0_i32, %c0_i32_0 : i32, i32, i32
  }
}

</mosaic_0001>

<bundles_post_ra>
// kernel: tpu_custom_call.1
= control target key start
LH: loop header
LB: loop body
LE: loop exit
PB: predicated region body
PF: predicated region fallthrough
CT: control target
= control target key end

     0   :  { %9 = vsyncpa [#allocation5], 0  ;;  %s1490_s0 = inlined_call_operand.hbm [shape: f32[2,4,16,16], index: 0, kind: input, shape index: {}]   ;;  %s1491_s1 = inlined_call_operand.vmem [shape: f32[8,36], index: 1, kind: input, shape index: {}]   ;;  %s1492_s2 = inlined_call_operand.vmem [shape: f32[8,1], index: 2, kind: input, shape index: {}]   ;;  %s1493_s3 = inlined_call_operand.vmem [shape: f32[8,1], index: 3, kind: input, shape index: {}]   ;;  %s1494_s4 = inlined_call_operand.hbm [shape: f32[2,8,256], index: 4, kind: output, shape index: {}]  }
   0x1   :  { %11 = vsyncpa [#allocation5 + $0x1], 0 }
   0x2   :  { %12 = vsyncpa [#allocation6], 0 }
   0x3   :  { %14 = vsyncpa [#allocation6 + $0x1], 0  ;;  %s1229_s15 = smov 0   ;;  %s1231_s16 = smov 0  }
   0x4   :  { %s1233_s17 = smov 0   ;;  %s1235_s18 = smov 0  }
   0x5 LB: > { %s1250_s19 = sadd.s32 4294967295, %s1187_s18   ;;  %s1015_s20 = sadd.s32 4294967294, %s1187_s18   ;;  %s1187_s18 = sphi %s1235_s18, %s1509_s18   ;;  %s1183_s17 = sphi %s1233_s17, %s1508_s17   ;;  %s1179_s16 = sphi %s1231_s16, %s1507_s16   ;;  %s1175_s15 = sphi %s1229_s15, %s1506_s15  }
   0x6   : > { %s1254_s21 = sadd.s32 1, %s1187_s18   ;;  %s27_s22 = sadd.s32 1, %s1183_s17 }
   0x7   : > { %s24_s23 = ssub.s32 %s1187_s18, %s1254_s21  ;;  %p34_p0 = scmp.ne.s32.totalorder %s1183_s17, %s1179_s16 }
   0x8   : > { %p25_p1 = scmp.eq.s32.totalorder %s24_s23, 0  ;;  %p35_p2 = scmp.eq.s32.totalorder %s1187_s18, 0 }
   0x9   : > { %p40_p3 = scmp.ne.s32.totalorder %s1179_s16, %s1175_s15  ;;  %p41_p4 = scmp.eq.s32.totalorder %s1250_s19, 0 }
   0xa   : > { %s1266_s24 = scalar_select %p25_p1, %s1183_s17, %s27_s22  }
   0xb   : > { %p1268_p5 = por %p35_p2, %p34_p0  ;;  %p1272_p6 = por %p41_p4, %p40_p3 }
   0xc   : > { %p127_p7 = scmp.eq.s32.totalorder %s1250_s19, 1  ;;  %p133_p8 = scmp.eq.s32.totalorder %s1015_s20, 1 }
   0xd   : > { %s1498_s26 = scalar_select %p1272_p6, 1, 0 }
   0xe   : > { %p1046_p10 = scmp.lt.s32.totalorder %s1187_s18, 2  ;;  %p1279_p11 = por %p127_p7, %p34_p0 }
   0xf   : > { %p1283_p12 = por %p133_p8, %p40_p3  ;;  %s162_s29 = sand.u32 1, %s1183_s17  }
  0x10   : > { %s1499_s27 = scalar_select %p1279_p11, 1, 0 }
  0x11   : > { %s1500_s28 = scalar_select %p1283_p12, 1, 0 }
  0x12   : > { %s1032_s30 = sshll.u32 %s1187_s18, 10  ;;  %s1018_s5 = sshll.u32 %s162_s29, 6 }
  0x13   : > { %s1292_s8 = scalar_lea.hbm %s1490_s0, %s1032_s30  ;;  %s166_s9 = scalar_lea.vmem [#allocation4], %s1018_s5 }
  0x14   : > { %s173_s10 = sshll.u32 %s166_s9, 4  ;;  %p1296_p13 = pnand %p1046_p10, %p1268_p5  ;;  %s1300_s10 = int_to_ptr.vmem [resolvable:$true] %s173_s10 }
  0x15   : > { %s1302_s12 = scalar_lea.sflag [#allocation5], %s162_s29  ;;  %s1095_s13 = scalar_lea.hbm %s1292_s8, 1024 }
  0x16   : > { %p1096_p0 = scmp.ne.s32.totalorder %s1292_s8, %s1095_s13  ;;  %p1097_p1 = pneg %p1296_p13 }
  0x17   : > { %s1100_s22 = scalar_lea.hbm %s1490_s0, 2048  ;;  %p1101_p4 = scmp.lt.s32.totalorder %s1292_s8, %s1490_s0 }
  0x18   : > { %p1098_p2 = pnand %p1097_p1, %p1096_p0  ;;  %p1102_p5 = scmp.lt.s32.totalorder %s1100_s22, %s1095_s13 }
  0x1a   : > { %p1099_p3 = pneg %p1098_p2  ;;  %p1103_p7 = por %p1102_p5, %p1101_p4 }
  0x1c   : > { %p1104_p8 = pnand %p1103_p7, %p1099_p3 }
  0x1e   : > { %1107 = shalt.err (!%p1104_p8)
}
  0x1f   : > { %s1108_s29 = scalar_lea.vmem %s1300_s10, 1024  ;;  %s1189_s30 = smov [#allocation4]  }
  0x20   : > { %p1109_p10 = scmp.ne.s32.totalorder %s1300_s10, %s1108_s29  ;;  %s1113_s5 = sshll.u32 %s1189_s30, 4  ;;  %s1114_s5 = int_to_ptr.vmem [resolvable:$false] %s1113_s5 }
  0x21   : > { %s1115_s6 = scalar_lea.vmem %s1114_s5, 2048  ;;  %p1116_p2 = scmp.lt.s32.totalorder %s1300_s10, %s1114_s5 }
  0x22   : > { %p1111_p9 = pnand %p1109_p10, %p1097_p1  ;;  %p1117_p12 = scmp.lt.s32.totalorder %s1115_s6, %s1108_s29 }
  0x24   : > { %p1112_p0 = pneg %p1111_p9  ;;  %p1118_p11 = por %p1117_p12, %p1116_p2 }
  0x26   : > { %p1119_p6 = pnand %p1118_p11, %p1112_p0 }
  0x28   : > { %1122 = shalt.err (!%p1119_p6)
}
  0x29   : > { %s1190_s7 = smov 128   ;;  %s1191_s9 = smov 8  }
  0x2a   : > { %1041 = dma.hbm_to_vmem [thread:$0]  (!%p1296_p13), %s1292_s8, 1024, %s1300_s10, %s1302_s12, %s1190_s7, %s1190_s7, %s1191_s9  }
  0x2b   : > { %p1021_p9 = scmp.ge.s32.totalorder %s1187_s18, 1  ;;  %p181_p1 = scmp.lt.s32.totalorder %s1187_s18, 3 }
  0x2d   : > { %p182_p3 = pnand %p1021_p9, %p181_p1 }
  0x2e   : > { %s1326_s13 = sand.u32 (!%p182_p3), 1, %s1179_s16   ;;  %p1502_p6 = scmp.ne.s32.totalorder (!%p182_p3), %s1498_s26, 0 }
  0x2f   : > { %185 = sbr.rel (%p182_p3) target bundleno = 698 (0x2ba), region = 36  ;;  %s1022_s14 = sshll.u32 (!%p182_p3), %s1326_s13, 6 }
  0x30   : > { %s188_s20 = scalar_lea.sflag (!%p182_p3), [#allocation5], %s1326_s13  ;;  %s1330_s22 = scalar_lea.vmem (!%p182_p3), [#allocation4], %s1022_s14 }
  0x34   : > { %1166 = dma.done.wait (%p1502_p6), %s188_s20, 1024  }
  0x35   : > { %1168 = vsyncadd (%p1502_p6), %s188_s20, 4294966272  ;;  %vm216_vm0 = vcmask 139264   ;;  %vm225_vm1 = vcmask 7168   ;;  %vm234_vm2 = vcmask 146568   ;;  %v1192_v0 = vmov 0.0   ;;  %v247_v1 = vld [vmem:[%s1330_s22 + $0x20] sm:$0xff] }
  0x36   : > { %217 = vst.msk [vmem:[#allocation2] sm:$0x1] %vm216_vm0, %v1192_v0  ;;  %218 = vst.msk [vmem:[#allocation2 + $0x18] sm:$0x1] %vm216_vm0, %v1192_v0  ;;  %903 = vmatprep.mubr.f32.mxu0 %v1192_v0  ;;  %v245_v2 = vld [vmem:[%s1330_s22 + $0x10] sm:$0xff]  ;;  %s1193_s26 = smov 1  }
  0x37   : > { %219 = vst.msk [vmem:[#allocation2 + $0x30] sm:$0x1] %vm216_vm0, %v1192_v0  ;;  %220 = vst.msk [vmem:[#allocation2 + $0x48] sm:$0x1] %vm216_vm0, %v1192_v0  ;;  %267 = vrot.lane.b32.xlu1 %v247_v1, %s1193_s26  ;;  %263 = vrot.lane.b32.xlu0 %v245_v2, %s1193_s26  ;;  %v249_v3 = vld [vmem:[%s1330_s22 + $0x30] sm:$0xff]  ;;  %v243_v4 = vld [vmem:[%s1330_s22] sm:$0xff] }
  0x38   : > { %230 = vst.msk [vmem:[#allocation2 + $0x31] sm:$0xff] %vm225_vm1, %v1192_v0  ;;  %226 = vst.msk [vmem:[#allocation2 + $0x1] sm:$0xff] %vm225_vm1, %v1192_v0  ;;  %v246_v5 = vld [vmem:[%s1330_s22 + $0x18] sm:$0xff]  ;;  %v244_v6 = vld [vmem:[%s1330_s22 + $0x8] sm:$0xff]  ;;  %vm283_vm3 = vcmask 138248   ;;  %vm301_vm4 = vcmask 1041409  }
  0x39   : > { %227 = vst.msk [vmem:[#allocation2 + $0x9] sm:$0xff] %vm225_vm1, %v1192_v0  ;;  %228 = vst.msk [vmem:[#allocation2 + $0x19] sm:$0xff] %vm225_vm1, %v1192_v0  ;;  %v248_v7 = vld [vmem:[%s1330_s22 + $0x28] sm:$0xff]  ;;  %v250_v8 = vld [vmem:[%s1330_s22 + $0x38] sm:$0xff]  ;;  %vm304_vm5 = vcmask 1042434   ;;  %vm307_vm6 = vcmask 1043459  }
  0x3a   : > { %229 = vst.msk [vmem:[#allocation2 + $0x21] sm:$0xff] %vm225_vm1, %v1192_v0  ;;  %231 = vst.msk [vmem:[#allocation2 + $0x39] sm:$0xff] %vm225_vm1, %v1192_v0  ;;  %vm310_vm7 = vcmask 142336   ;;  %vm457_vm8 = vcmask 1045509   ;;  %vm460_vm9 = vcmask 1046534   ;;  %vm463_vm10 = vcmask 1047559  }
  0x3b   : > { %232 = vst.msk [vmem:[#allocation2 + $0x49] sm:$0xff] %vm225_vm1, %v1192_v0  ;;  %233 = vst.msk [vmem:[#allocation2 + $0x51] sm:$0xff] %vm225_vm1, %v1192_v0  ;;  %271 = vrot.lane.b32.xlu1 %v249_v3, %s1193_s26  ;;  %259 = vrot.lane.b32.xlu0 %v243_v4, %s1193_s26  ;;  %s1194_s8 = smov 18   ;;  %s1195_s10 = smov 36   ;;  %vm466_vm11 = vcmask 146436   ;;  %vm329_vm12 = vcmask 289936  }
  0x3c   : > { %239 = vst.msk [vmem:[#allocation2 + $0x31] sm:$0xff] %vm234_vm2, %v1192_v0  ;;  %237 = vst.msk [vmem:[#allocation2 + $0x19] sm:$0xff] %vm234_vm2, %v1192_v0  ;;  %s1196_s11 = smov 54   ;;  %s1197_s12 = smov 72   ;;  %vm486_vm13 = vcmask 294036   ;;  %vm348_vm14 = vcmask 437536  }
  0x3d   : > { %235 = vst.msk [vmem:[#allocation2 + $0x1] sm:$0xff] %vm234_vm2, %v1192_v0  ;;  %236 = vst.msk [vmem:[#allocation2 + $0x9] sm:$0xff] %vm234_vm2, %v1192_v0  ;;  %v292_v11 = vld [vmem:[#allocation2] sm:$0x1]  ;;  %v293_v12 = vld [vmem:[#allocation2 + $0x18] sm:$0x1] }
  0x3e   : > { %238 = vst.msk [vmem:[#allocation2 + $0x21] sm:$0xff] %vm234_vm2, %v1192_v0  ;;  %240 = vst.msk [vmem:[#allocation2 + $0x39] sm:$0xff] %vm234_vm2, %v1192_v0  ;;  %v294_v13 = vld [vmem:[#allocation2 + $0x30] sm:$0x1]  ;;  %v295_v16 = vld [vmem:[#allocation2 + $0x48] sm:$0x1] }
  0x3f   : > { %241 = vst.msk [vmem:[#allocation2 + $0x49] sm:$0xff] %vm234_vm2, %v1192_v0  ;;  %242 = vst.msk [vmem:[#allocation2 + $0x51] sm:$0xff] %vm234_vm2, %v1192_v0  ;;  %265 = vrot.lane.b32.xlu0 %v246_v5, %s1193_s26  ;;  %261 = vrot.lane.b32.xlu1 %v244_v6, %s1193_s26  ;;  %v300_v17 = vrot.slane %v293_v12, 7  ;;  %v303_v18 = vrot.slane %v294_v13, 6  ;;  %v306_v19 = vrot.slane %v295_v16, 5  ;;  %s1198_s23 = smov 90  }
  0x40   : > { %s1199_s25 = smov 108   ;;  %s1200_s29 = smov 126   ;;  %vm506_vm15 = vcmask 441636   ;;  %vm367_vm0 = vcmask 585136   ;;  %vm526_vm1 = vcmask 589236   ;;  %vm386_vm2 = vcmask 732736  }
  0x41   : > { %v302_v20 = vsel %vm301_vm4, %v300_v17, %v292_v11  ;;  %s1201_s30 = smov 127   ;;  %s1023_s22 = sshll.u32 %s1326_s13, 4 }
  0x42   : > { %v305_v21 = vsel %vm304_vm5, %v303_v18, %v302_v20  ;;  %p1503_p12 = scmp.ne.s32.totalorder %s1499_s27, 0 }
  0x43   : > { %269 = vrot.lane.b32.xlu0 %v248_v7, %s1193_s26  ;;  %273 = vrot.lane.b32.xlu1 %v250_v8, %s1193_s26  ;;  %v308_v27 = vsel %vm307_vm6, %v306_v19, %v305_v21  ;;  %s1033_s26 = sshll.u32 %s1250_s19, 8 }
  0x44   : > { %311 = vst.msk [vmem:[#allocation3] sm:$0xf] %vm310_vm7, %v308_v27 }
  0xa9   : > { %v268_v9 = vpop.permute.xlu1 %267  ;;  %v264_v10 = vpop.permute.xlu0 %263 }
  0xaa   : > { %288 = vst.msk [vmem:[#allocation2 + $0x31] sm:$0xff] %vm283_vm3, %v268_v9  ;;  %286 = vst.msk [vmem:[#allocation2 + $0x19] sm:$0xff] %vm283_vm3, %v264_v10 }
  0xad   : > { %v272_v14 = vpop.permute.xlu1 %271  ;;  %v260_v15 = vpop.permute.xlu0 %259 }
  0xae   : > { %290 = vst.msk [vmem:[#allocation2 + $0x49] sm:$0xff] %vm283_vm3, %v272_v14  ;;  %284 = vst.msk [vmem:[#allocation2 + $0x1] sm:$0xff] %vm283_vm3, %v260_v15 }
  0xb1   : > { %v266_v22 = vpop.permute.xlu0 %265  ;;  %v262_v23 = vpop.permute.xlu1 %261  ;;  %v627_v24 = vld [vmem:[#allocation2 + $0x1c] sm:$0x1]  ;;  %v628_v25 = vld [vmem:[#allocation2 + $0x34] sm:$0x1]  ;;  %v313_v26 = vld [vmem:[#allocation2 + $0x1a] sm:$0x1] }
  0xb2   : > { %287 = vst.msk [vmem:[#allocation2 + $0x21] sm:$0xff] %vm283_vm3, %v266_v22  ;;  %285 = vst.msk [vmem:[#allocation2 + $0x9] sm:$0xff] %vm283_vm3, %v262_v23  ;;  %v634_v28 = vrot.slane %v627_v24, 7  ;;  %v314_v29 = vld [vmem:[#allocation2 + $0x32] sm:$0x1]  ;;  %v636_v30 = vrot.slane %v628_v25, 6 }
  0xb3   : > { %v320_v31 = vrot.slane %v313_v26, 7  ;;  %v469_v32 = vld [vmem:[#allocation2 + $0x1b] sm:$0x1]  ;;  %v470_v33 = vld [vmem:[#allocation2 + $0x33] sm:$0x1]  ;;  %v322_v34 = vrot.slane %v314_v29, 6 }
  0xb4   : > { %v477_v35 = vrot.slane %v469_v32, 3  ;;  %v645_v36 = vld [vmem:[#allocation2 + $0x1e] sm:$0x1]  ;;  %v646_v37 = vld [vmem:[#allocation2 + $0x36] sm:$0x1]  ;;  %v479_v56 = vrot.slane %v470_v33, 2 }
  0xb5   : > { %v626_v38 = vld [vmem:[#allocation2 + $0x4] sm:$0x1]  ;;  %v629_v39 = vld [vmem:[#allocation2 + $0x4c] sm:$0x1]  ;;  %v312_v40 = vld [vmem:[#allocation2 + $0x2] sm:$0x1]  ;;  %v270_v41 = vpop.permute.xlu0 %269  ;;  %v274_v42 = vpop.permute.xlu1 %273 }
  0xb6   : > { %v635_v43 = vsel %vm301_vm4, %v634_v28, %v626_v38  ;;  %v638_v44 = vrot.slane %v629_v39, 5  ;;  %v315_v45 = vld [vmem:[#allocation2 + $0x4a] sm:$0x1]  ;;  %v321_v46 = vsel %vm301_vm4, %v320_v31, %v312_v40  ;;  %289 = vst.msk [vmem:[#allocation2 + $0x39] sm:$0xff] %vm283_vm3, %v270_v41  ;;  %291 = vst.msk [vmem:[#allocation2 + $0x51] sm:$0xff] %vm283_vm3, %v274_v42  ;;  %v652_v48 = vrot.slane %v645_v36, 7 }
  0xb7   : > { %v468_v47 = vld [vmem:[#allocation2 + $0x3] sm:$0x1]  ;;  %v637_v49 = vsel %vm304_vm5, %v636_v30, %v635_v43  ;;  %v323_v50 = vsel %vm304_vm5, %v322_v34, %v321_v46  ;;  %v324_v51 = vrot.slane %v315_v45, 5  ;;  %v471_v52 = vld [vmem:[#allocation2 + $0x4b] sm:$0x1]  ;;  %v654_v59 = vrot.slane %v646_v37, 6 }
  0xb8   : > { %v476_v53 = vrot.slane %v468_v47, 4  ;;  %v644_v54 = vld [vmem:[#allocation2 + $0x6] sm:$0x1]  ;;  %v639_v55 = vsel %vm307_vm6, %v638_v44, %v637_v49  ;;  %v647_v57 = vld [vmem:[#allocation2 + $0x4e] sm:$0x1]  ;;  %v481_v63 = vrot.slane %v471_v52, 1 }
  0xb9   : > { %v653_v58 = vsel %vm301_vm4, %v652_v48, %v644_v54  ;;  %v331_v60 = vld [vmem:[#allocation2 + $0x4] sm:$0x1]  ;;  %640 = vrot.lane.b32.xlu0 %v639_v55, %s1194_s8  ;;  %v325_v61 = vsel %vm307_vm6, %v324_v51, %v323_v50  ;;  %v656_v0 = vrot.slane %v647_v57, 5  ;;  %v332_v1 = vld [vmem:[#allocation2 + $0x1c] sm:$0x1]  ;;  %vm546_vm3 = vcmask 736836  }
  0xba   : > { %v478_v62 = vsel %vm457_vm8, %v477_v35, %v476_v53  ;;  %v333_v2 = vld [vmem:[#allocation2 + $0x34] sm:$0x1]  ;;  %326 = vrot.lane.b32.xlu1 %v325_v61, %s1194_s8  ;;  %v655_v4 = vsel %vm304_vm5, %v654_v59, %v653_v58  ;;  %v334_v5 = vld [vmem:[#allocation2 + $0x4c] sm:$0x1]  ;;  %v339_v6 = vrot.slane %v332_v1, 7 }
  0xbb   : > { %v480_v3 = vsel %vm460_vm9, %v479_v56, %v478_v62  ;;  %v488_v7 = vld [vmem:[#allocation2 + $0x5] sm:$0x1]  ;;  %v341_v9 = vrot.slane %v333_v2, 6  ;;  %v489_v10 = vld [vmem:[#allocation2 + $0x1d] sm:$0x1]  ;;  %v343_v14 = vrot.slane %v334_v5, 5  ;;  %v657_v18 = vsel %vm307_vm6, %v656_v0, %v655_v4 }
  0xbc   : > { %v482_v8 = vsel %vm463_vm10, %v481_v63, %v480_v3  ;;  %v490_v11 = vld [vmem:[#allocation2 + $0x35] sm:$0x1]  ;;  %v496_v12 = vrot.slane %v488_v7, 4  ;;  %v340_v13 = vsel %vm301_vm4, %v339_v6, %v331_v60  ;;  %v491_v15 = vld [vmem:[#allocation2 + $0x4d] sm:$0x1]  ;;  %v497_v16 = vrot.slane %v489_v10, 3 }
  0xbd   : > { %v499_v17 = vrot.slane %v490_v11, 2  ;;  %483 = vrot.lane.b32.xlu0 %v482_v8, %s1194_s8  ;;  %v342_v19 = vsel %vm304_vm5, %v341_v9, %v340_v13  ;;  %v662_v20 = vld [vmem:[#allocation2 + $0x8] sm:$0x1]  ;;  %v663_v21 = vld [vmem:[#allocation2 + $0x20] sm:$0x1]  ;;  %v501_v24 = vrot.slane %v491_v15, 1 }
  0xbe   : > { %v664_v22 = vld [vmem:[#allocation2 + $0x38] sm:$0x1]  ;;  %658 = vrot.lane.b32.xlu1 %v657_v18, %s1195_s10  ;;  %v498_v23 = vsel %vm457_vm8, %v497_v16, %v496_v12  ;;  %v665_v25 = vld [vmem:[#allocation2 + $0x50] sm:$0x1]  ;;  %v670_v26 = vrot.slane %v663_v21, 7  ;;  %v344_v33 = vsel %vm307_vm6, %v343_v14, %v342_v19  ;;  %s215_s8 = scalar_lea.vmem [#allocation7], %s1023_s22 }
  0xbf   : > { %v350_v27 = vld [vmem:[#allocation2 + $0x6] sm:$0x1]  ;;  %v500_v28 = vsel %vm460_vm9, %v499_v17, %v498_v23  ;;  %v672_v29 = vrot.slane %v664_v22, 6  ;;  %v674_v30 = vrot.slane %v665_v25, 5  ;;  %v351_v31 = vld [vmem:[#allocation2 + $0x1e] sm:$0x1] }
  0xc0   : > { %v352_v32 = vld [vmem:[#allocation2 + $0x36] sm:$0x1]  ;;  %v671_v34 = vsel %vm301_vm4, %v670_v26, %v662_v20  ;;  %v353_v35 = vld [vmem:[#allocation2 + $0x4e] sm:$0x1]  ;;  %v358_v36 = vrot.slane %v351_v31, 7  ;;  %v502_v39 = vsel %vm463_vm10, %v501_v24, %v500_v28 }
  0xc1   : > { %v360_v37 = vrot.slane %v352_v32, 6  ;;  %v508_v38 = vld [vmem:[#allocation2 + $0x7] sm:$0x1]  ;;  %345 = vrot.lane.b32.xlu0 %v344_v33, %s1195_s10  ;;  %v673_v40 = vsel %vm304_vm5, %v672_v29, %v671_v34  ;;  %v362_v41 = vrot.slane %v353_v35, 5  ;;  %v509_v42 = vld [vmem:[#allocation2 + $0x1f] sm:$0x1] }
  0xc2   : > { %v510_v43 = vld [vmem:[#allocation2 + $0x37] sm:$0x1]  ;;  %v516_v44 = vrot.slane %v508_v38, 4  ;;  %503 = vrot.lane.b32.xlu1 %v502_v39, %s1195_s10  ;;  %v359_v45 = vsel %vm301_vm4, %v358_v36, %v350_v27  ;;  %v511_v46 = vld [vmem:[#allocation2 + $0x4f] sm:$0x1]  ;;  %v517_v47 = vrot.slane %v509_v42, 3  ;;  %v675_v53 = vsel %vm307_vm6, %v674_v30, %v673_v40 }
  0xc3   : > { %v519_v48 = vrot.slane %v510_v43, 2  ;;  %v361_v49 = vsel %vm304_vm5, %v360_v37, %v359_v45  ;;  %v680_v50 = vld [vmem:[#allocation2 + $0xa] sm:$0x1]  ;;  %v681_v51 = vld [vmem:[#allocation2 + $0x22] sm:$0x1]  ;;  %v521_v61 = vrot.slane %v511_v46, 1 }
  0xc4   : > { %v682_v52 = vld [vmem:[#allocation2 + $0x3a] sm:$0x1]  ;;  %v518_v54 = vsel %vm457_vm8, %v517_v47, %v516_v44  ;;  %v683_v55 = vld [vmem:[#allocation2 + $0x52] sm:$0x1]  ;;  %v688_v56 = vrot.slane %v681_v51, 7  ;;  %v363_v59 = vsel %vm307_vm6, %v362_v41, %v361_v49  ;;  %s945_s10 = sshll.u32 %s215_s8, 4  ;;  %s946_s10 = int_to_ptr.vmem [resolvable:$true] %s945_s10 }
  0xc5   : > { %v690_v57 = vrot.slane %v682_v52, 6  ;;  %v369_v58 = vld [vmem:[#allocation2 + $0x8] sm:$0x1]  ;;  %676 = vrot.lane.b32.xlu0 %v675_v53, %s1196_s11  ;;  %v520_v60 = vsel %vm460_vm9, %v519_v48, %v518_v54  ;;  %v692_v62 = vrot.slane %v683_v55, 5  ;;  %v370_v63 = vld [vmem:[#allocation2 + $0x20] sm:$0x1] }
  0xc6   : > { %v371_v0 = vld [vmem:[#allocation2 + $0x38] sm:$0x1]  ;;  %364 = vrot.lane.b32.xlu1 %v363_v59, %s1196_s11  ;;  %v689_v1 = vsel %vm301_vm4, %v688_v56, %v680_v50  ;;  %v372_v2 = vld [vmem:[#allocation2 + $0x50] sm:$0x1]  ;;  %v377_v3 = vrot.slane %v370_v63, 7  ;;  %v522_v6 = vsel %vm463_vm10, %v521_v61, %v520_v60 }
  0xc7   : > { %v379_v4 = vrot.slane %v371_v0, 6  ;;  %v528_v5 = vld [vmem:[#allocation2 + $0x9] sm:$0x1]  ;;  %v691_v7 = vsel %vm304_vm5, %v690_v57, %v689_v1  ;;  %v381_v8 = vrot.slane %v372_v2, 5  ;;  %v529_v9 = vld [vmem:[#allocation2 + $0x21] sm:$0x1] }
  0xc8   : > { %v530_v10 = vld [vmem:[#allocation2 + $0x39] sm:$0x1]  ;;  %v536_v11 = vrot.slane %v528_v5, 4  ;;  %v693_v12 = vsel %vm307_vm6, %v692_v62, %v691_v7  ;;  %v378_v13 = vsel %vm301_vm4, %v377_v3, %v369_v58  ;;  %v531_v14 = vld [vmem:[#allocation2 + $0x51] sm:$0x1]  ;;  %v537_v15 = vrot.slane %v529_v9, 3 }
  0xc9   : > { %v539_v16 = vrot.slane %v530_v10, 2  ;;  %v698_v17 = vld [vmem:[#allocation2 + $0xc] sm:$0x1]  ;;  %523 = vrot.lane.b32.xlu0 %v522_v6, %s1196_s11  ;;  %v380_v18 = vsel %vm304_vm5, %v379_v4, %v378_v13  ;;  %v541_v19 = vrot.slane %v531_v14, 1  ;;  %v699_v20 = vld [vmem:[#allocation2 + $0x24] sm:$0x1] }
  0xca   : > { %v700_v21 = vld [vmem:[#allocation2 + $0x3c] sm:$0x1]  ;;  %694 = vrot.lane.b32.xlu1 %v693_v12, %s1197_s12  ;;  %v538_v22 = vsel %vm457_vm8, %v537_v15, %v536_v11  ;;  %v701_v23 = vld [vmem:[#allocation2 + $0x54] sm:$0x1]  ;;  %v706_v24 = vrot.slane %v699_v20, 7  ;;  %v382_v31 = vsel %vm307_vm6, %v381_v8, %v380_v18 }
  0xcb   : > { %v708_v25 = vrot.slane %v700_v21, 6  ;;  %v388_v26 = vld [vmem:[#allocation2 + $0xa] sm:$0x1]  ;;  %v540_v27 = vsel %vm460_vm9, %v539_v16, %v538_v22  ;;  %v710_v28 = vrot.slane %v701_v23, 5  ;;  %v389_v29 = vld [vmem:[#allocation2 + $0x22] sm:$0x1] }
  0xcc   : > { %v390_v30 = vld [vmem:[#allocation2 + $0x3a] sm:$0x1]  ;;  %v707_v32 = vsel %vm301_vm4, %v706_v24, %v698_v17  ;;  %v391_v33 = vld [vmem:[#allocation2 + $0x52] sm:$0x1]  ;;  %v396_v34 = vrot.slane %v389_v29, 7  ;;  %v542_v37 = vsel %vm463_vm10, %v541_v19, %v540_v27 }
  0xcd   : > { %v398_v35 = vrot.slane %v390_v30, 6  ;;  %v548_v36 = vld [vmem:[#allocation2 + $0xb] sm:$0x1]  ;;  %383 = vrot.lane.b32.xlu0 %v382_v31, %s1197_s12  ;;  %v709_v38 = vsel %vm304_vm5, %v708_v25, %v707_v32  ;;  %v400_v39 = vrot.slane %v391_v33, 5  ;;  %v549_v40 = vld [vmem:[#allocation2 + $0x23] sm:$0x1] }
  0xce   : > { %v550_v41 = vld [vmem:[#allocation2 + $0x3b] sm:$0x1]  ;;  %v556_v42 = vrot.slane %v548_v36, 4  ;;  %543 = vrot.lane.b32.xlu1 %v542_v37, %s1197_s12  ;;  %v397_v43 = vsel %vm301_vm4, %v396_v34, %v388_v26  ;;  %v551_v44 = vld [vmem:[#allocation2 + $0x53] sm:$0x1]  ;;  %v557_v45 = vrot.slane %v549_v40, 3  ;;  %v711_v52 = vsel %vm307_vm6, %v710_v28, %v709_v38 }
  0xcf   : > { %v559_v46 = vrot.slane %v550_v41, 2  ;;  %v716_v47 = vld [vmem:[#allocation2 + $0xe] sm:$0x1]  ;;  %v399_v48 = vsel %vm304_vm5, %v398_v35, %v397_v43  ;;  %v561_v49 = vrot.slane %v551_v44, 1  ;;  %v717_v50 = vld [vmem:[#allocation2 + $0x26] sm:$0x1] }
  0xd0   : > { %v718_v51 = vld [vmem:[#allocation2 + $0x3e] sm:$0x1]  ;;  %v558_v53 = vsel %vm457_vm8, %v557_v45, %v556_v42  ;;  %v719_v54 = vld [vmem:[#allocation2 + $0x56] sm:$0x1]  ;;  %v724_v55 = vrot.slane %v717_v50, 7  ;;  %v401_v58 = vsel %vm307_vm6, %v400_v39, %v399_v48 }
  0xd1   : > { %v726_v56 = vrot.slane %v718_v51, 6  ;;  %v407_v57 = vld [vmem:[#allocation2 + $0xc] sm:$0x1]  ;;  %712 = vrot.lane.b32.xlu0 %v711_v52, %s1198_s23  ;;  %v560_v59 = vsel %vm460_vm9, %v559_v46, %v558_v53  ;;  %v728_v60 = vrot.slane %v719_v54, 5  ;;  %v408_v61 = vld [vmem:[#allocation2 + $0x24] sm:$0x1] }
  0xd2   : > { %v409_v62 = vld [vmem:[#allocation2 + $0x3c] sm:$0x1]  ;;  %402 = vrot.lane.b32.xlu1 %v401_v58, %s1198_s23  ;;  %v725_v63 = vsel %vm301_vm4, %v724_v55, %v716_v47  ;;  %v410_v0 = vld [vmem:[#allocation2 + $0x54] sm:$0x1]  ;;  %v415_v1 = vrot.slane %v408_v61, 7  ;;  %v562_v9 = vsel %vm463_vm10, %v561_v49, %v560_v59 }
  0xd3   : > { %v417_v2 = vrot.slane %v409_v62, 6  ;;  %v568_v3 = vld [vmem:[#allocation2 + $0xd] sm:$0x1]  ;;  %v727_v4 = vsel %vm304_vm5, %v726_v56, %v725_v63  ;;  %v419_v5 = vrot.slane %v410_v0, 5  ;;  %v569_v6 = vld [vmem:[#allocation2 + $0x25] sm:$0x1] }
  0xd4   : > { %v570_v7 = vld [vmem:[#allocation2 + $0x3d] sm:$0x1]  ;;  %v576_v8 = vrot.slane %v568_v3, 4  ;;  %v416_v10 = vsel %vm301_vm4, %v415_v1, %v407_v57  ;;  %v571_v11 = vld [vmem:[#allocation2 + $0x55] sm:$0x1]  ;;  %v577_v12 = vrot.slane %v569_v6, 3  ;;  %v729_v15 = vsel %vm307_vm6, %v728_v60, %v727_v4 }
  0xd5   : > { %v579_v13 = vrot.slane %v570_v7, 2  ;;  %v734_v14 = vld [vmem:[#allocation2 + $0x10] sm:$0x1]  ;;  %563 = vrot.lane.b32.xlu0 %v562_v9, %s1198_s23  ;;  %v418_v16 = vsel %vm304_vm5, %v417_v2, %v416_v10  ;;  %v581_v17 = vrot.slane %v571_v11, 1  ;;  %v735_v18 = vld [vmem:[#allocation2 + $0x28] sm:$0x1]  ;;  %s943_s23 = scalar_lea.hbm %s1494_s4, %s1033_s26 }
  0xd6   : > { %v736_v19 = vld [vmem:[#allocation2 + $0x40] sm:$0x1]  ;;  %730 = vrot.lane.b32.xlu1 %v729_v15, %s1199_s25  ;;  %v578_v20 = vsel %vm457_vm8, %v577_v12, %v576_v8  ;;  %v737_v21 = vld [vmem:[#allocation2 + $0x58] sm:$0x1]  ;;  %v742_v22 = vrot.slane %v735_v18, 7  ;;  %v420_v29 = vsel %vm307_vm6, %v419_v5, %v418_v16 }
  0xd7   : > { %v744_v23 = vrot.slane %v736_v19, 6  ;;  %v426_v24 = vld [vmem:[#allocation2 + $0xe] sm:$0x1]  ;;  %v580_v25 = vsel %vm460_vm9, %v579_v13, %v578_v20  ;;  %v746_v26 = vrot.slane %v737_v21, 5  ;;  %v427_v27 = vld [vmem:[#allocation2 + $0x26] sm:$0x1] }
  0xd8   : > { %v428_v28 = vld [vmem:[#allocation2 + $0x3e] sm:$0x1]  ;;  %v743_v30 = vsel %vm301_vm4, %v742_v22, %v734_v14  ;;  %v429_v31 = vld [vmem:[#allocation2 + $0x56] sm:$0x1]  ;;  %v434_v32 = vrot.slane %v427_v27, 7  ;;  %v582_v35 = vsel %vm463_vm10, %v581_v17, %v580_v25 }
  0xd9   : > { %v436_v33 = vrot.slane %v428_v28, 6  ;;  %v588_v34 = vld [vmem:[#allocation2 + $0xf] sm:$0x1]  ;;  %421 = vrot.lane.b32.xlu0 %v420_v29, %s1199_s25  ;;  %v745_v36 = vsel %vm304_vm5, %v744_v23, %v743_v30  ;;  %v438_v37 = vrot.slane %v429_v31, 5  ;;  %v589_v38 = vld [vmem:[#allocation2 + $0x27] sm:$0x1] }
  0xda   : > { %v590_v39 = vld [vmem:[#allocation2 + $0x3f] sm:$0x1]  ;;  %v596_v40 = vrot.slane %v588_v34, 4  ;;  %583 = vrot.lane.b32.xlu1 %v582_v35, %s1199_s25  ;;  %v435_v41 = vsel %vm301_vm4, %v434_v32, %v426_v24  ;;  %v591_v42 = vld [vmem:[#allocation2 + $0x57] sm:$0x1]  ;;  %v597_v43 = vrot.slane %v589_v38, 3  ;;  %v747_v51 = vsel %vm307_vm6, %v746_v26, %v745_v36 }
  0xdb   : > { %v599_v44 = vrot.slane %v590_v39, 2  ;;  %v611_v45 = vld [vmem:[#allocation2 + $0x1a] sm:$0x1]  ;;  %v437_v46 = vsel %vm304_vm5, %v436_v33, %v435_v41  ;;  %v601_v47 = vrot.slane %v591_v42, 1  ;;  %v612_v48 = vld [vmem:[#allocation2 + $0x32] sm:$0x1] }
  0xdc   : > { %v613_v49 = vld [vmem:[#allocation2 + $0x4a] sm:$0x1]  ;;  %v618_v50 = vrot.slane %v611_v45, 7  ;;  %v598_v52 = vsel %vm457_vm8, %v597_v43, %v596_v40  ;;  %v620_v53 = vrot.slane %v612_v48, 6  ;;  %v610_v55 = vld [vmem:[#allocation2 + $0x2] sm:$0x1]  ;;  %v439_v57 = vsel %vm307_vm6, %v438_v37, %v437_v46 }
  0xdd   : > { %v622_v54 = vrot.slane %v613_v49, 5  ;;  %v448_v56 = vld [vmem:[#allocation2 + $0x19] sm:$0x1]  ;;  %748 = vrot.lane.b32.xlu0 %v747_v51, %s1200_s29  ;;  %v600_v58 = vsel %vm460_vm9, %v599_v44, %v598_v52  ;;  %v449_v60 = vld [vmem:[#allocation2 + $0x31] sm:$0x1]  ;;  %v1202_v42 = vmov 0  }
  0xde   : > { %v619_v59 = vsel %vm301_vm4, %v618_v50, %v610_v55  ;;  %440 = vrot.lane.b32.xlu1 %v439_v57, %s1200_s29  ;;  %v450_v62 = vld [vmem:[#allocation2 + $0x49] sm:$0x1]  ;;  %v447_v63 = vld [vmem:[#allocation2 + $0x1] sm:$0x1]  ;;  %v456_v1 = vrot.slane %v448_v56, 3  ;;  %v602_v3 = vsel %vm463_vm10, %v601_v47, %v600_v58  ;;  %v459_v4 = vrot.slane %v449_v60, 2  ;;  %1094 = vset.pattern.permute.xlu0 %v1202_v42 }
  0xdf   : > { %v621_v61 = vsel %vm304_vm5, %v620_v53, %v619_v59  ;;  %v455_v2 = vrot.slane %v447_v63, 4  ;;  %v462_v5 = vrot.slane %v450_v62, 1  ;;  %vm405_vm4 = vcmask 880336   ;;  %1093 = vset.pattern.permute.xlu1 %v1202_v42  ;;  %v910_v43 = vld [vmem:[%s1492_s2] sm:$0xff]  ;;  %s931_s25 = scalar_lea.sflag [#allocation6], %s1326_s13 }
  0xe0   : > { %v623_v0 = vsel %vm307_vm6, %v622_v54, %v621_v61  ;;  %vm566_vm5 = vcmask 884436   ;;  %vm424_vm6 = vcmask 1027936   ;;  %v918_v44 = vld [vmem:[%s1493_s3] sm:$0xff] }
  0xe1   : > { %625 = vst.msk [vmem:[#allocation3 + $0x10] sm:$0xf] %vm310_vm7, %v623_v0  ;;  %603 = vrot.lane.b32.xlu0 %v602_v3, %s1200_s29  ;;  %v458_v6 = vsel %vm457_vm8, %v456_v1, %v455_v2  ;;  %vm586_vm7 = vcmask 1032036   ;;  %vm443_vm8 = vcmask 1044464   ;;  %v818_v63 = vld [vmem:[%s1491_s1] sm:$0xff] }
  0xe2   : > { %v461_v7 = vsel %vm460_vm9, %v459_v4, %v458_v6  ;;  %vm445_vm9 = vcmask 125952  }
  0xe3   : > { %v464_v8 = vsel %vm463_vm10, %v462_v5, %v461_v7  ;;  %vm606_vm10 = vcmask 1048564  }
  0xe4   : > { %467 = vst.msk [vmem:[#allocation3] sm:$0xf0] %vm466_vm11, %v464_v8  ;;  %vm608_vm11 = vcmask 130052  }
 0x12b   : > { %v641_v9 = vpop.permute.xlu0 %640 }
 0x12c   : > { %643 = vst.msk [vmem:[#allocation3 + $0x10] sm:$0xf] %vm329_vm12, %v641_v9  ;;  %v327_v10 = vpop.permute.xlu1 %326 }
 0x12d   : > { %330 = vst.msk [vmem:[#allocation3] sm:$0xf] %vm329_vm12, %v327_v10  ;;  %vm761_vm12 = vcmask 1043456  }
 0x12f   : > { %v484_v11 = vpop.permute.xlu0 %483 }
 0x130   : > { %487 = vst.msk [vmem:[#allocation3] sm:$0xf0] %vm486_vm13, %v484_v11  ;;  %v659_v12 = vpop.permute.xlu1 %658  ;;  %vm816_vm13 = vcmask 109568  }
 0x131   : > { %661 = vst.msk [vmem:[#allocation3 + $0x10] sm:$0xf] %vm348_vm14, %v659_v12 }
 0x133   : > { %v346_v13 = vpop.permute.xlu0 %345 }
 0x134   : > { %349 = vst.msk [vmem:[#allocation3] sm:$0xf] %vm348_vm14, %v346_v13  ;;  %v504_v14 = vpop.permute.xlu1 %503  ;;  %vm805_vm14 = vcmask 1031168  }
 0x135   : > { %507 = vst.msk [vmem:[#allocation3] sm:$0xf0] %vm506_vm15, %v504_v14  ;;  %vm813_vm15 = vcmask 113664  }
 0x137   : > { %v677_v15 = vpop.permute.xlu0 %676 }
 0x138   : > { %679 = vst.msk [vmem:[#allocation3 + $0x10] sm:$0xf] %vm367_vm0, %v677_v15  ;;  %v365_v16 = vpop.permute.xlu1 %364 }
 0x139   : > { %368 = vst.msk [vmem:[#allocation3] sm:$0xf] %vm367_vm0, %v365_v16  ;;  %vm787_vm0 = vcmask 121856  }
 0x13b   : > { %v524_v17 = vpop.permute.xlu0 %523 }
 0x13c   : > { %527 = vst.msk [vmem:[#allocation3] sm:$0xf0] %vm526_vm1, %v524_v17  ;;  %v695_v18 = vpop.permute.xlu1 %694  ;;  %vm776_vm1 = vcmask 1039360  }
 0x13d   : > { %697 = vst.msk [vmem:[#allocation3 + $0x10] sm:$0xf] %vm386_vm2, %v695_v18 }
 0x13f   : > { %v384_v19 = vpop.permute.xlu0 %383 }
 0x140   : > { %387 = vst.msk [vmem:[#allocation3] sm:$0xf] %vm386_vm2, %v384_v19  ;;  %v544_v20 = vpop.permute.xlu1 %543  ;;  %vm784_vm2 = vcmask 121860  }
 0x141   : > { %547 = vst.msk [vmem:[#allocation3] sm:$0xf0] %vm546_vm3, %v544_v20  ;;  %vm829_vm3 = vcmask 293888  }
 0x143   : > { %v713_v21 = vpop.permute.xlu0 %712 }
 0x144   : > { %715 = vst.msk [vmem:[#allocation3 + $0x10] sm:$0xf] %vm405_vm4, %v713_v21  ;;  %v403_v22 = vpop.permute.xlu1 %402 }
 0x145   : > { %406 = vst.msk [vmem:[#allocation3] sm:$0xf] %vm405_vm4, %v403_v22 }
 0x147   : > { %v564_v23 = vpop.permute.xlu0 %563 }
 0x148   : > { %567 = vst.msk [vmem:[#allocation3] sm:$0xf0] %vm566_vm5, %v564_v23  ;;  %v731_v24 = vpop.permute.xlu1 %730 }
 0x149   : > { %733 = vst.msk [vmem:[#allocation3 + $0x10] sm:$0xf] %vm424_vm6, %v731_v24 }
 0x14b   : > { %v422_v25 = vpop.permute.xlu0 %421 }
 0x14c   : > { %425 = vst.msk [vmem:[#allocation3] sm:$0xf] %vm424_vm6, %v422_v25  ;;  %v584_v26 = vpop.permute.xlu1 %583 }
 0x14d   : > { %587 = vst.msk [vmem:[#allocation3] sm:$0xf0] %vm586_vm7, %v584_v26 }
 0x14f   : > { %v749_v27 = vpop.permute.xlu0 %748 }
 0x150   : > { %751 = vst.msk [vmem:[#allocation3 + $0x10] sm:$0xf] %vm443_vm8, %v749_v27  ;;  %v441_v28 = vpop.permute.xlu1 %440 }
 0x151   : > { %752 = vst.msk [vmem:[#allocation3 + $0x18] sm:$0xf] %vm445_vm9, %v749_v27  ;;  %446 = vst.msk [vmem:[#allocation3 + $0x8] sm:$0xf] %vm445_vm9, %v441_v28 }
 0x152   : > { %444 = vst.msk [vmem:[#allocation3] sm:$0xf] %vm443_vm8, %v441_v28 }
 0x153   : > { %v604_v29 = vpop.permute.xlu0 %603 }
 0x154   : > { %607 = vst.msk [vmem:[#allocation3] sm:$0xf0] %vm606_vm10, %v604_v29 }
 0x155   : > { %609 = vst.msk [vmem:[#allocation3 + $0x8] sm:$0xf0] %vm608_vm11, %v604_v29 }
 0x157   : > { %v791_v31 = vld [vmem:[#allocation3 + $0x10] sm:$0xf] }
 0x158   : > { %v792_v30 = vld [vmem:[#allocation3 + $0x18] sm:$0xf]  ;;  %801 = vrot.lane.b32.xlu1 %v791_v31, %s1200_s29  ;;  %v755_v33 = vld [vmem:[#allocation3 + $0x10] sm:$0xf] }
 0x159   : > { %803 = vrot.lane.b32.xlu0 %v792_v30, %s1200_s29  ;;  %v756_v32 = vld [vmem:[#allocation3 + $0x18] sm:$0xf]  ;;  %v764_v39 = vrot.slane %v755_v33, 4 }
 0x15a   : > { %v766_v37 = vrot.slane %v756_v32, 4 }
 0x15b   : > { %v789_v35 = vld [vmem:[#allocation3] sm:$0xff] }
 0x15c   : > { %v790_v34 = vld [vmem:[#allocation3 + $0x8] sm:$0xff]  ;;  %797 = vrot.lane.b32.xlu1 %v789_v35, %s1200_s29  ;;  %v762_v38 = vrot.slane %v789_v35, 4 }
 0x15d   : > { %799 = vrot.lane.b32.xlu0 %v790_v34, %s1200_s29  ;;  %v763_v36 = vrot.slane %v790_v34, 4  ;;  %s1123_s29 = scalar_lea.vmem %s946_s10, 256 }
 0x15e   : > { %v765_v41 = vsel %vm761_vm12, %v762_v38, %v764_v39  ;;  %p1124_p11 = scmp.ne.s32.totalorder %s946_s10, %s1123_s29 }
 0x15f   : > { %v767_v40 = vsel %vm761_vm12, %v763_v36, %v766_v37 }
 0x160   : > { %772 = vrot.lane.b32.xlu1 %v765_v41, %s1201_s30  ;;  %p1125_p13 = pnand %p1124_p11, %p1503_p12 }
 0x161   : > { %774 = vrot.lane.b32.xlu0 %v767_v40, %s1201_s30 }
 0x162   : > { %p1126_p4 = pneg %p1125_p13 }
 0x164   : > { %768 = vrot.lane.b32.xlu1 %v762_v38, %s1201_s30 }
 0x165   : > { %770 = vrot.lane.b32.xlu0 %v763_v36, %s1201_s30  ;;  %s1203_s30 = smov [#allocation7]  }
 0x166   : > { %s1127_s19 = sshll.u32 %s1203_s30, 4  ;;  %s1128_s19 = int_to_ptr.vmem [resolvable:$false] %s1127_s19 }
 0x167   : > { %s1129_s5 = scalar_lea.vmem %s1128_s19, 512  ;;  %p1130_p5 = scmp.lt.s32.totalorder %s946_s10, %s1128_s19 }
 0x168   : > { %913 = vperm.xlu1 %1093, %v910_v43   ;;  %p1131_p7 = scmp.lt.s32.totalorder %s1129_s5, %s1123_s29 }
 0x169   : > { %921 = vperm.xlu0 %1094, %v918_v44  }
 0x16a   : > { %p1132_p8 = por %p1131_p7, %p1130_p5 }
 0x16c   : > { %p1133_p10 = pnand %p1132_p8, %p1126_p4 }
 0x1ca   : > { %v802_v46 = vpop.permute.xlu1 %801 }
 0x1cb   : > { %v804_v45 = vpop.permute.xlu0 %803 }
 0x1cc   : > { %817 = vst.msk [vmem:[#allocation3 + $0x48] sm:$0xf] %vm816_vm13, %v804_v45  ;;  %v807_v47 = vsel %vm805_vm14, %v802_v46, %v804_v45 }
 0x1cd   : > { %815 = vst [vmem:[#allocation3 + $0x40] sm:$0xf] %v807_v47 }
 0x1ce   : > { %v798_v49 = vpop.permute.xlu1 %797 }
 0x1cf   : > { %v800_v48 = vpop.permute.xlu0 %799 }
 0x1d0   : > { %814 = vst.msk [vmem:[#allocation3 + $0x38] sm:$0xff] %vm813_vm15, %v800_v48  ;;  %v806_v50 = vsel %vm805_vm14, %v798_v49, %v800_v48 }
 0x1d2   : > { %v773_v52 = vpop.permute.xlu1 %772 }
 0x1d3   : > { %v775_v51 = vpop.permute.xlu0 %774  ;;  %v828_v53 = vld [vmem:[#allocation3 + $0x48] sm:$0xf] }
 0x1d4   : > { %788 = vst.msk [vmem:[#allocation3 + $0x28] sm:$0xff] %vm787_vm0, %v775_v51  ;;  %v778_v54 = vsel %vm776_vm1, %v773_v52, %v775_v51  ;;  %1024 = vmatprep.subr.msk.mxu0 %vm761_vm12, %v828_v53  ;;  %v827_v55 = vld [vmem:[#allocation3 + $0x40] sm:$0xf] }
 0x1d5   : > { %1025 = vmatpush1.msk.msra.mxu0 %vm761_vm12, %v827_v55 }
 0x1d6   : > { %v769_v57 = vpop.permute.xlu1 %768 }
 0x1d7   : > { %v771_v56 = vpop.permute.xlu0 %770  ;;  %v826_v58 = vld [vmem:[#allocation3 + $0x38] sm:$0xff] }
 0x1d8   : > { %785 = vst.msk [vmem:[#allocation3 + $0x18] sm:$0xf0] %vm784_vm2, %v771_v56  ;;  %v777_v59 = vsel %vm776_vm1, %v769_v57, %v771_v56  ;;  %863 = vmatprep.subr.mxu0 %v826_v58 }
 0x1d9   : > { %783 = vst [vmem:[#allocation3 + $0x10] sm:$0xf0] %v777_v59  ;;  %864 = vmatpush1.msra.mxu0 %v806_v50 }
 0x1db   : > { %v824_v60 = vld [vmem:[#allocation3 + $0x28] sm:$0xff] }
 0x1dc   : > { %865 = vmatprep.subr.mxu0 %v824_v60 }
 0x1dd   : > { %866 = vmatpush1.msra.mxu0 %v778_v54 }
 0x1df   : > { %v822_v61 = vld [vmem:[#allocation3 + $0x18] sm:$0xff] }
 0x1e0   : > { %867 = vmatprep.subr.mxu0 %v822_v61  ;;  %v821_v62 = vld [vmem:[#allocation3 + $0x10] sm:$0xff] }
 0x1e1   : > { %868 = vmatpush1.msra.mxu0 %v821_v62 }
 0x1e2   : > { %869 = vmatprep.subr.mxu0 %v790_v34 }
 0x1e3   : > { %870 = vmatpush1.msra.mxu0 %v789_v35  ;;  %v914_v0 = vpop.permute.xlu1 %913 }
 0x1e4   : > { %1026 = vmatmul.mubr.msk.f32.vlgmr.msra.gmra.mxu0 %vm829_vm3, %v818_v63  ;;  %v922_v2 = vpop.permute.xlu0 %921 }
 0x2a4   : > { %v905_v1 = vpop.f32.mrf.mxu0 }
 0x2a5   : > { %v916_v3 = vmul.f32 %v914_v0, %v905_v1 }
 0x2a6   : > { %v907_v4 = vpop.f32.mrf.mxu0 }
 0x2a7   : > { %v924_v5 = vadd.f32 %v922_v2, %v916_v3  ;;  %v917_v6 = vmul.f32 %v914_v0, %v907_v4 }
 0x2a9   : > { %v926_v7 = vmax.f32 %v924_v5, 0.0  ;;  %v925_v8 = vadd.f32 %v922_v2, %v917_v6 }
 0x2ab   : > { %928 = vst [vmem:[%s215_s8] sm:$0xff] %v926_v7  ;;  %v927_v9 = vmax.f32 %v925_v8, 0.0 }
 0x2ad   : > { %929 = vst [vmem:[%s215_s8 + $0x8] sm:$0xff] %v927_v9 }
 0x2ae   : > { %1136 = shalt.err (!%p1133_p10)
}
 0x2af   : > { %s1137_s6 = scalar_lea.hbm %s943_s23, 256  ;;  %s1141_s9 = scalar_lea.hbm %s1494_s4, 512 }
 0x2b0   : > { %p1138_p0 = scmp.ne.s32.totalorder %s943_s23, %s1137_s6  ;;  %p1142_p1 = scmp.lt.s32.totalorder %s943_s23, %s1494_s4 }
 0x2b1   : > { %p1143_p3 = scmp.lt.s32.totalorder %s1141_s9, %s1137_s6 }
 0x2b2   : > { %p1139_p2 = pnand %p1138_p0, %p1503_p12 }
 0x2b3   : > { %p1144_p6 = por %p1143_p3, %p1142_p1 }
 0x2b4   : > { %p1140_p9 = pneg %p1139_p2 }
 0x2b6   : > { %p1145_p11 = pnand %p1144_p6, %p1140_p9 }
 0x2b8   : > { %1148 = shalt.err (!%p1145_p11)
}
 0x2b9   : > { %1036 = dma.vmem_to_hbm [thread:$0]  (%p1503_p12), %s946_s10, 256, %s943_s23, %s931_s25  }
 0x2ba PF: > { %s957_s22 = sand.u32 1, %s1175_s15   ;;  %p1504_p13 = scmp.ne.s32.totalorder %s1500_s28, 0 }
 0x2bb   : > { %p1505_p4 = scmp.ge.s32.totalorder %s1187_s18, 2  ;;  %s958_s26 = scalar_lea.sflag [#allocation6], %s957_s22 }
 0x2bd   : > { %p1043_p5 = pnand %p1505_p4, %p1504_p13 }
 0x2bf   : > { %p1044_p7 = pneg %p1043_p5 }
 0x2c1   : > { %1170 = dma.done.wait (%p1044_p7), %s958_s26, 256  }
 0x2c2   : > { %1172 = vsyncadd (%p1044_p7), %s958_s26, 4294967040  ;;  %p17_p8 = scmp.ge.s32.totalorder %s1254_s21, 4   ;;  %s1506_s15 = smov %s1179_s16 }
 0x2c3   : > { %s1507_s16 = smov %s1183_s17  ;;  %s1508_s17 = smov %s1266_s24 }
 0x2c4   : > { %s1509_s18 = smov %s1254_s21  ;;  %19 = sbr.rel (!%p17_p8) target bundleno = 5 (0x5), region = 81 }
 0x2c9   :  { %963 = vsyncpa [#allocation5], 1 }
 0x2ca   :  { %965 = vsyncpa [#allocation5 + $0x1], 1 }
 0x2cb   :  { %966 = vsyncpa [#allocation6], 1 }
 0x2cc   :  { %968 = vsyncpa [#allocation6 + $0x1], 1 }

</bundles_post_ra>
